<compile_context>
chip_gen: v7x
topology: tpu7x:2x2x1
jax: 0.10.0
libtpu: 0.0.40
codegen_flags: <defaults>
</compile_context>

<pallas_src>
import functools

import numpy as np
import jax
import jax.numpy as jnp
from jax.experimental import pallas as pl
from jax.experimental.pallas import tpu as pltpu

_LANE = 128          # TPU lane width (last-dim alignment target)
_SUBLANE = 8         # f32 sublane tile
_BF16_SUBLANE = 16   # bf16 sublane tile (row-pad granularity for bf16 operands)

_VMEM_SPEC = pl.BlockSpec(memory_space=pltpu.MemorySpace.VMEM)


def _round_up(x, m):
    return ((x + m - 1) // m) * m


# ----------------------------------------------------------------------------
# Fused Pallas kernel: in-kernel gather + encoder MLP + one-hot prototype
# matmul + -sqrt pairwise distances.  One grid step == one episode.
# ----------------------------------------------------------------------------
def fused_protonet_kernel(sup_idx_ref, qry_idx_ref,                 # SMEM (scalar prefetch)
                          samples_ref, w1_ref, b1_ref, w2_ref, b2_ref,  # VMEM (resident)
                          out_ref,                                   # VMEM output block
                          xs_ref,                                    # VMEM scratch slab
                          *, num_classes, num_support, n_sup, n_sup_pad,
                          q_max, q_rows_pad):
    ep = pl.program_id(0)
    d_pad = xs_ref.shape[1]
    zero_row = jnp.zeros((1, d_pad), jnp.float32)

    # ---- gather this episode's support + query rows from the resident dataset ----
    for r in range(n_sup):
        xs_ref[r:r + 1, :] = samples_ref[pl.ds(sup_idx_ref[ep, r], 1), :]
    for r in range(n_sup, n_sup_pad):                 # zero alignment-pad rows
        xs_ref[r:r + 1, :] = zero_row
    for r in range(q_max):
        xs_ref[n_sup_pad + r:n_sup_pad + r + 1, :] = \
            samples_ref[pl.ds(qry_idx_ref[ep, r], 1), :]
    for r in range(q_max, q_rows_pad):
        xs_ref[n_sup_pad + r:n_sup_pad + r + 1, :] = zero_row

    # ---- encoder: Linear -> ReLU -> Linear (bf16 MXU operands, f32 accumulation) ----
    x_bf = xs_ref[...].astype(jnp.bfloat16)
    h = jnp.dot(x_bf, w1_ref[...], preferred_element_type=jnp.float32) + b1_ref[...]
    h = jnp.maximum(h, 0.0)        # ReLU (dropout=0.0 -> no Dropout layer)
    e = jnp.dot(h.astype(jnp.bfloat16), w2_ref[...],
                preferred_element_type=jnp.float32) + b2_ref[...]    # [N, D] f32

    # ---- prototypes: one-hot averaging matmul, already zero-padded to Cp lanes ----
    cp = out_ref.shape[1]
    cls = jax.lax.broadcasted_iota(jnp.int32, (cp, n_sup_pad), 0)    # class id
    col = jax.lax.broadcasted_iota(jnp.int32, (cp, n_sup_pad), 1)    # support-row id
    onehot = jnp.where(
        (cls < num_classes)
        & (col >= cls * num_support)
        & (col < (cls + 1) * num_support),
        jnp.float32(1.0 / num_support), jnp.float32(0.0))
    proto = jnp.dot(onehot, e[:n_sup_pad, :],
                    preferred_element_type=jnp.float32)              # [Cp, D]

    # ---- pairwise sqrt-Euclidean distances (torch.clamp(min=1e-8) + sqrt) ----
    qry = e[n_sup_pad:, :]                                           # [Qp, D]
    qn = jnp.sum(qry * qry, axis=1, keepdims=True)                   # [Qp, 1]
    pn = jnp.sum(proto * proto, axis=1, keepdims=True)               # [Cp, 1]
    cross = jax.lax.dot_general(
        qry.astype(jnp.bfloat16), proto.astype(jnp.bfloat16),
        (((1,), (1,)), ((), ())), preferred_element_type=jnp.float32)  # [Qp, Cp]
    dist = jnp.maximum(qn + jnp.transpose(pn) - 2.0 * cross, 1e-8)
    out_ref[...] = -jnp.sqrt(dist)


# ----------------------------------------------------------------------------
# Jitted batched-episode forward: one pallas_call, grid over episodes.
# All shapes are static functions of the episode config -> no recompiles.
# ----------------------------------------------------------------------------
@functools.partial(jax.jit, static_argnames=("c", "s"))
def _episodes_forward(samples_dev, sup_idx, qry_idx, w1, b1, w2, b2, *, c, s):
    num_episodes, n_sup = sup_idx.shape
    q_max = qry_idx.shape[1]
    d_pad = samples_dev.shape[1]
    n_sup_pad = _round_up(n_sup, _BF16_SUBLANE)
    q_rows_pad = _round_up(q_max, _BF16_SUBLANE)
    cp = _round_up(c, _LANE)

    kernel = functools.partial(
        fused_protonet_kernel, num_classes=c, num_support=s,
        n_sup=n_sup, n_sup_pad=n_sup_pad, q_max=q_max, q_rows_pad=q_rows_pad)

    grid_spec = pltpu.PrefetchScalarGridSpec(
        num_scalar_prefetch=2,                      # sup_idx, qry_idx -> SMEM
        grid=(num_episodes,),
        in_specs=[_VMEM_SPEC] * 5,                  # samples, w1, b1, w2, b2 stay resident
        out_specs=pl.BlockSpec((None, q_rows_pad, cp), lambda e, *_: (e, 0, 0)),
        scratch_shapes=[pltpu.VMEM((n_sup_pad + q_rows_pad, d_pad), jnp.float32)],
    )

    # TODO(synk): for datasets / hidden dims too large for whole-array VMEM
    # residency (esp. v7x's 64 MiB), switch `samples` to memory_space=pl.ANY with an
    # in-kernel DMA gather, add a K-tiled grid + vmem_limit_bytes.
    return pl.pallas_call(
        kernel,
        out_shape=jax.ShapeDtypeStruct((num_episodes, q_rows_pad, cp), jnp.float32),
        grid_spec=grid_spec,
        compiler_params=pltpu.CompilerParams(
            dimension_semantics=("parallel",)),
    )(sup_idx, qry_idx, samples_dev, w1, b1, w2, b2)


# ----------------------------------------------------------------------------
# Protonet module (JAX/Pallas re-implementation of the PyTorch forward)
# ----------------------------------------------------------------------------
class Protonet:
    def __init__(self, input_dim, layers_dim, dropout=0.0, seed=0):
        # TODO(synk): generalize to arbitrary encoder depth (spec default is 2 layers).
        assert len(layers_dim) == 2, "this implementation fixes a 2-layer encoder"
        # TODO(synk): dropout > 0 (train-mode RNG dropout) not implemented.
        assert dropout == 0.0, "dropout=0 -> ProtonetEncoder adds no Dropout layer"
        self.input_dim = input_dim
        self.layers_dim = tuple(layers_dim)
        h1, h2 = self.layers_dim

        # pad feature dims to the 128-lane width; zero rows/cols are inert
        dp = _round_up(input_dim, _LANE)
        h1p = _round_up(h1, _LANE)
        h2p = _round_up(h2, _LANE)
        self._d_pad = dp
        self._samples_cache = None   # (id(samples), padded device array)

        rng = np.random.default_rng(seed)

        def init_linear(fan_in, fan_out, fan_in_p, fan_out_p):
            # deterministic U(-1/sqrt(fan_in), +1/sqrt(fan_in)) init (nn.Linear-style
            # range; RNG stream differs from PyTorch), zero-padded to lane width.
            bound = 1.0 / np.sqrt(fan_in)
            w = np.zeros((fan_in_p, fan_out_p), np.float32)
            b = np.zeros((1, fan_out_p), np.float32)
            w[:fan_in, :fan_out] = rng.uniform(-bound, bound, size=(fan_in, fan_out))
            b[0, :fan_out] = rng.uniform(-bound, bound, size=(fan_out,))
            # weights in bf16 (fast MXU path on v6e/v7x), biases stay f32
            return jnp.asarray(w, dtype=jnp.bfloat16), jnp.asarray(b)

        self.w1, self.b1 = init_linear(input_dim, h1, dp, h1p)
        self.w2, self.b2 = init_linear(h1, h2, h1p, h2p)

    # -- dataset cache: pad + upload the sample matrix to device exactly once ----
    def _get_samples_dev(self, samples):
        key = id(samples)
        if self._samples_cache is None or self._samples_cache[0] != key:
            arr = np.asarray(samples, dtype=np.float32)
            n, d = arr.shape
            assert d == self.input_dim
            n_pad = _round_up(n, _SUBLANE)
            padded = np.zeros((n_pad, self._d_pad), np.float32)
            padded[:n, :d] = arr
            self._samples_cache = (key, jnp.asarray(padded))
        return self._samples_cache[1]

    # -- host-side data-dependent episode sampling (matches the PyTorch reference) --
    @staticmethod
    def _sample_episode(rng, classes_np, unique_classes, c, s, nq):
        random_classes = rng.choice(np.asarray(unique_classes), c, replace=False).astype(int)
        sup_rows, qry_rows, query_classes = [], [], []
        for target_class_idx, target_class in enumerate(random_classes):
            sel = np.nonzero(classes_np == target_class)[0]
            perm = rng.permutation(sel.shape[0])
            sup_rows.append(sel[perm[:s]])
            qi = sel[perm[s:s + nq]]
            qry_rows.append(qi)
            query_classes.extend([target_class_idx] * qi.shape[0])
        sup_idx = np.concatenate(sup_rows).astype(np.int32)
        qry_idx = np.concatenate(qry_rows).astype(np.int32)
        assert sup_idx.shape[0] == c * s, \
            "every sampled class must have at least num_support_per_class samples"
        return sup_idx, qry_idx, np.asarray(query_classes, np.int32)

    # -- batched path: E episodes, one kernel launch, parallel grid over episodes ----
    def forward_episodes(self, samples, classes, unique_classes,
                         num_classes_per_episode, num_support_per_class,
                         num_query_per_class, num_episodes=1, episode_rng=None):
        rng = episode_rng if episode_rng is not None else np.random.default_rng(0)
        classes_np = np.asarray(classes)
        c, s, nq = num_classes_per_episode, num_support_per_class, num_query_per_class
        q_max = c * nq                                     # static query capacity

        sup_all = np.zeros((num_episodes, c * s), np.int32)
        qry_all = np.zeros((num_episodes, q_max), np.int32)   # dummy index 0 padding
        q_counts, query_classes_all = [], []
        for e in range(num_episodes):
            sup_idx, qry_idx, qc = self._sample_episode(rng, classes_np,
                                                        unique_classes, c, s, nq)
            sup_all[e] = sup_idx
            qry_all[e, :qry_idx.shape[0]] = qry_idx
            q_counts.append(int(qry_idx.shape[0]))
            query_classes_all.append(jnp.asarray(qc))

        samples_dev = self._get_samples_dev(samples)
        out = _episodes_forward(samples_dev, jnp.asarray(sup_all), jnp.asarray(qry_all),
                                self.w1, self.b1, self.w2, self.b2, c=c, s=s)
        neg_dists = [out[e, :q_counts[e], :c] for e in range(num_episodes)]
        return neg_dists, query_classes_all

    # -- spec semantics: one episode per forward() call -------------------------------
    def forward(self, samples, classes, unique_classes, num_classes_per_episode,
                num_support_per_class, num_query_per_class, episode_rng=None):
        neg_dists, query_classes = self.forward_episodes(
            samples, classes, unique_classes, num_classes_per_episode,
            num_support_per_class, num_query_per_class,
            num_episodes=1, episode_rng=episode_rng)
        return neg_dists[0], query_classes[0]


# ----------------------------------------------------------------------------
if __name__ == "__main__":
    key = jax.random.PRNGKey(0)

    input_dim = 32
    hidden = (32, 32)
    n_total_classes = 5
    samples_per_class = 10
    n_samples = n_total_classes * samples_per_class

    samples = jax.random.normal(key, (n_samples, input_dim), dtype=jnp.float32)
    classes = np.repeat(np.arange(n_total_classes), samples_per_class)
    unique_classes = np.arange(n_total_classes)

    net = Protonet(input_dim=input_dim, layers_dim=hidden, dropout=0.0, seed=0)

    # single-episode spec forward (E=1)
    neg_dists, query_classes = net.forward(
        samples, classes, unique_classes,
        num_classes_per_episode=3,
        num_support_per_class=4,
        num_query_per_class=4,
        episode_rng=np.random.default_rng(0),
    )
    neg_dists = jax.block_until_ready(neg_dists)
    query_classes = jax.block_until_ready(query_classes)
    assert neg_dists.shape == (3 * 4, 3)
    assert query_classes.shape == (3 * 4,)
    assert bool(jnp.all(jnp.isfinite(neg_dists)))
    assert bool(jnp.all(neg_dists <= 0.0))

    # second call with the same config: cached compile + cached device dataset
    neg_dists2, _ = net.forward(
        samples, classes, unique_classes, 3, 4, 4,
        episode_rng=np.random.default_rng(7))
    neg_dists2 = jax.block_until_ready(neg_dists2)
    assert neg_dists2.shape == (12, 3)

    # batched path: 2 episodes in one launch on a parallel grid
    neg_list, qc_list = net.forward_episodes(
        samples, classes, unique_classes,
        num_classes_per_episode=3, num_support_per_class=4, num_query_per_class=4,
        num_episodes=2, episode_rng=np.random.default_rng(1))
    for nd, qc in zip(neg_list, qc_list):
        nd = jax.block_until_ready(nd)
        assert nd.shape == (12, 3)
        assert qc.shape == (12,)
        assert bool(jnp.all(jnp.isfinite(nd)))
        assert bool(jnp.all(nd <= 0.0))

    print("KERNEL_OK")
</pallas_src>

<mosaic_0001>
module attributes {stable_mosaic.version = 11 : i64} {
  func.func @fused_protonet_kernel(%arg0: i32, %arg1: memref<1x12xi32, #tpu.memory_space<smem>>, %arg2: memref<1x12xi32, #tpu.memory_space<smem>>, %arg3: memref<56x128xf32, #tpu.memory_space<vmem>>, %arg4: memref<128x128xbf16, #tpu.memory_space<vmem>>, %arg5: memref<1x128xf32, #tpu.memory_space<vmem>>, %arg6: memref<128x128xbf16, #tpu.memory_space<vmem>>, %arg7: memref<1x128xf32, #tpu.memory_space<vmem>>, %arg8: memref<1x16x128xf32, #tpu.memory_space<vmem>>, %arg9: memref<32x128xf32, #tpu.memory_space<vmem>>) attributes {dimension_semantics = [#tpu.dimension_semantics<parallel>], iteration_bounds = array<i64: 1>, scalar_prefetch = 2 : i64, scratch_operands = 1 : i64, tpu.core_type = #tpu.core_type<tc>, window_params = [{pipeline_mode = #tpu.pipeline_mode<synchronous>, transform_indices = @transform_0, window_bounds = array<i64: 56, 128>}, {pipeline_mode = #tpu.pipeline_mode<synchronous>, transform_indices = @transform_1, window_bounds = array<i64: 128, 128>}, {pipeline_mode = #tpu.pipeline_mode<synchronous>, transform_indices = @transform_2, window_bounds = array<i64: 1, 128>}, {pipeline_mode = #tpu.pipeline_mode<synchronous>, transform_indices = @transform_3, window_bounds = array<i64: 128, 128>}, {pipeline_mode = #tpu.pipeline_mode<synchronous>, transform_indices = @transform_4, window_bounds = array<i64: 1, 128>}, {transform_indices = @transform_5, window_bounds = array<i64: 1, 16, 128>}]} {
    %cst = arith.constant 0.000000e+00 : f32
    %0 = vector.broadcast %cst : f32 to vector<1x128xf32>
    %1 = arith.index_cast %arg0 : i32 to index
    %c0 = arith.constant 0 : index
    %2 = memref.load %arg1[%1, %c0] : memref<1x12xi32, #tpu.memory_space<smem>>
    %3 = arith.index_cast %2 : i32 to index
    %c0_0 = arith.constant 0 : index
    %4 = vector.load %arg3[%3, %c0_0] : memref<56x128xf32, #tpu.memory_space<vmem>>, vector<1x128xf32>
    %c0_1 = arith.constant 0 : index
    %c0_2 = arith.constant 0 : index
    %5 = vector.load %arg9[%c0_1, %c0_2] : memref<32x128xf32, #tpu.memory_space<vmem>>, vector<1x128xf32>
    tpu.vector_store %arg9[%c0_1, %c0_2], %4 {strides = array<i32>} : memref<32x128xf32, #tpu.memory_space<vmem>>, vector<1x128xf32>,
    %6 = arith.index_cast %arg0 : i32 to index
    %c1 = arith.constant 1 : index
    %7 = memref.load %arg1[%6, %c1] : memref<1x12xi32, #tpu.memory_space<smem>>
    %8 = arith.index_cast %7 : i32 to index
    %c0_3 = arith.constant 0 : index
    %9 = vector.load %arg3[%8, %c0_3] : memref<56x128xf32, #tpu.memory_space<vmem>>, vector<1x128xf32>
    %c1_4 = arith.constant 1 : index
    %c0_5 = arith.constant 0 : index
    %10 = vector.load %arg9[%c1_4, %c0_5] : memref<32x128xf32, #tpu.memory_space<vmem>>, vector<1x128xf32>
    tpu.vector_store %arg9[%c1_4, %c0_5], %9 {strides = array<i32>} : memref<32x128xf32, #tpu.memory_space<vmem>>, vector<1x128xf32>,
    %11 = arith.index_cast %arg0 : i32 to index
    %c2 = arith.constant 2 : index
    %12 = memref.load %arg1[%11, %c2] : memref<1x12xi32, #tpu.memory_space<smem>>
    %13 = arith.index_cast %12 : i32 to index
    %c0_6 = arith.constant 0 : index
    %14 = vector.load %arg3[%13, %c0_6] : memref<56x128xf32, #tpu.memory_space<vmem>>, vector<1x128xf32>
    %c2_7 = arith.constant 2 : index
    %c0_8 = arith.constant 0 : index
    %15 = vector.load %arg9[%c2_7, %c0_8] : memref<32x128xf32, #tpu.memory_space<vmem>>, vector<1x128xf32>
    tpu.vector_store %arg9[%c2_7, %c0_8], %14 {strides = array<i32>} : memref<32x128xf32, #tpu.memory_space<vmem>>, vector<1x128xf32>,
    %16 = arith.index_cast %arg0 : i32 to index
    %c3 = arith.constant 3 : index
    %17 = memref.load %arg1[%16, %c3] : memref<1x12xi32, #tpu.memory_space<smem>>
    %18 = arith.index_cast %17 : i32 to index
    %c0_9 = arith.constant 0 : index
    %19 = vector.load %arg3[%18, %c0_9] : memref<56x128xf32, #tpu.memory_space<vmem>>, vector<1x128xf32>
    %c3_10 = arith.constant 3 : index
    %c0_11 = arith.constant 0 : index
    %20 = vector.load %arg9[%c3_10, %c0_11] : memref<32x128xf32, #tpu.memory_space<vmem>>, vector<1x128xf32>
    tpu.vector_store %arg9[%c3_10, %c0_11], %19 {strides = array<i32>} : memref<32x128xf32, #tpu.memory_space<vmem>>, vector<1x128xf32>,
    %21 = arith.index_cast %arg0 : i32 to index
    %c4 = arith.constant 4 : index
    %22 = memref.load %arg1[%21, %c4] : memref<1x12xi32, #tpu.memory_space<smem>>
    %23 = arith.index_cast %22 : i32 to index
    %c0_12 = arith.constant 0 : index
    %24 = vector.load %arg3[%23, %c0_12] : memref<56x128xf32, #tpu.memory_space<vmem>>, vector<1x128xf32>
    %c4_13 = arith.constant 4 : index
    %c0_14 = arith.constant 0 : index
    %25 = vector.load %arg9[%c4_13, %c0_14] : memref<32x128xf32, #tpu.memory_space<vmem>>, vector<1x128xf32>
    tpu.vector_store %arg9[%c4_13, %c0_14], %24 {strides = array<i32>} : memref<32x128xf32, #tpu.memory_space<vmem>>, vector<1x128xf32>,
    %26 = arith.index_cast %arg0 : i32 to index
    %c5 = arith.constant 5 : index
    %27 = memref.load %arg1[%26, %c5] : memref<1x12xi32, #tpu.memory_space<smem>>
    %28 = arith.index_cast %27 : i32 to index
    %c0_15 = arith.constant 0 : index
    %29 = vector.load %arg3[%28, %c0_15] : memref<56x128xf32, #tpu.memory_space<vmem>>, vector<1x128xf32>
    %c5_16 = arith.constant 5 : index
    %c0_17 = arith.constant 0 : index
    %30 = vector.load %arg9[%c5_16, %c0_17] : memref<32x128xf32, #tpu.memory_space<vmem>>, vector<1x128xf32>
    tpu.vector_store %arg9[%c5_16, %c0_17], %29 {strides = array<i32>} : memref<32x128xf32, #tpu.memory_space<vmem>>, vector<1x128xf32>,
    %31 = arith.index_cast %arg0 : i32 to index
    %c6 = arith.constant 6 : index
    %32 = memref.load %arg1[%31, %c6] : memref<1x12xi32, #tpu.memory_space<smem>>
    %33 = arith.index_cast %32 : i32 to index
    %c0_18 = arith.constant 0 : index
    %34 = vector.load %arg3[%33, %c0_18] : memref<56x128xf32, #tpu.memory_space<vmem>>, vector<1x128xf32>
    %c6_19 = arith.constant 6 : index
    %c0_20 = arith.constant 0 : index
    %35 = vector.load %arg9[%c6_19, %c0_20] : memref<32x128xf32, #tpu.memory_space<vmem>>, vector<1x128xf32>
    tpu.vector_store %arg9[%c6_19, %c0_20], %34 {strides = array<i32>} : memref<32x128xf32, #tpu.memory_space<vmem>>, vector<1x128xf32>,
    %36 = arith.index_cast %arg0 : i32 to index
    %c7 = arith.constant 7 : index
    %37 = memref.load %arg1[%36, %c7] : memref<1x12xi32, #tpu.memory_space<smem>>
    %38 = arith.index_cast %37 : i32 to index
    %c0_21 = arith.constant 0 : index
    %39 = vector.load %arg3[%38, %c0_21] : memref<56x128xf32, #tpu.memory_space<vmem>>, vector<1x128xf32>
    %c7_22 = arith.constant 7 : index
    %c0_23 = arith.constant 0 : index
    %40 = vector.load %arg9[%c7_22, %c0_23] : memref<32x128xf32, #tpu.memory_space<vmem>>, vector<1x128xf32>
    tpu.vector_store %arg9[%c7_22, %c0_23], %39 {strides = array<i32>} : memref<32x128xf32, #tpu.memory_space<vmem>>, vector<1x128xf32>,
    %41 = arith.index_cast %arg0 : i32 to index
    %c8 = arith.constant 8 : index
    %42 = memref.load %arg1[%41, %c8] : memref<1x12xi32, #tpu.memory_space<smem>>
    %43 = arith.index_cast %42 : i32 to index
    %c0_24 = arith.constant 0 : index
    %44 = vector.load %arg3[%43, %c0_24] : memref<56x128xf32, #tpu.memory_space<vmem>>, vector<1x128xf32>
    %c8_25 = arith.constant 8 : index
    %c0_26 = arith.constant 0 : index
    %45 = vector.load %arg9[%c8_25, %c0_26] : memref<32x128xf32, #tpu.memory_space<vmem>>, vector<1x128xf32>
    tpu.vector_store %arg9[%c8_25, %c0_26], %44 {strides = array<i32>} : memref<32x128xf32, #tpu.memory_space<vmem>>, vector<1x128xf32>,
    %46 = arith.index_cast %arg0 : i32 to index
    %c9 = arith.constant 9 : index
    %47 = memref.load %arg1[%46, %c9] : memref<1x12xi32, #tpu.memory_space<smem>>
    %48 = arith.index_cast %47 : i32 to index
    %c0_27 = arith.constant 0 : index
    %49 = vector.load %arg3[%48, %c0_27] : memref<56x128xf32, #tpu.memory_space<vmem>>, vector<1x128xf32>
    %c9_28 = arith.constant 9 : index
    %c0_29 = arith.constant 0 : index
    %50 = vector.load %arg9[%c9_28, %c0_29] : memref<32x128xf32, #tpu.memory_space<vmem>>, vector<1x128xf32>
    tpu.vector_store %arg9[%c9_28, %c0_29], %49 {strides = array<i32>} : memref<32x128xf32, #tpu.memory_space<vmem>>, vector<1x128xf32>,
    %51 = arith.index_cast %arg0 : i32 to index
    %c10 = arith.constant 10 : index
    %52 = memref.load %arg1[%51, %c10] : memref<1x12xi32, #tpu.memory_space<smem>>
    %53 = arith.index_cast %52 : i32 to index
    %c0_30 = arith.constant 0 : index
    %54 = vector.load %arg3[%53, %c0_30] : memref<56x128xf32, #tpu.memory_space<vmem>>, vector<1x128xf32>
    %c10_31 = arith.constant 10 : index
    %c0_32 = arith.constant 0 : index
    %55 = vector.load %arg9[%c10_31, %c0_32] : memref<32x128xf32, #tpu.memory_space<vmem>>, vector<1x128xf32>
    tpu.vector_store %arg9[%c10_31, %c0_32], %54 {strides = array<i32>} : memref<32x128xf32, #tpu.memory_space<vmem>>, vector<1x128xf32>,
    %56 = arith.index_cast %arg0 : i32 to index
    %c11 = arith.constant 11 : index
    %57 = memref.load %arg1[%56, %c11] : memref<1x12xi32, #tpu.memory_space<smem>>
    %58 = arith.index_cast %57 : i32 to index
    %c0_33 = arith.constant 0 : index
    %59 = vector.load %arg3[%58, %c0_33] : memref<56x128xf32, #tpu.memory_space<vmem>>, vector<1x128xf32>
    %c11_34 = arith.constant 11 : index
    %c0_35 = arith.constant 0 : index
    %60 = vector.load %arg9[%c11_34, %c0_35] : memref<32x128xf32, #tpu.memory_space<vmem>>, vector<1x128xf32>
    tpu.vector_store %arg9[%c11_34, %c0_35], %59 {strides = array<i32>} : memref<32x128xf32, #tpu.memory_space<vmem>>, vector<1x128xf32>,
    %c12 = arith.constant 12 : index
    %c0_36 = arith.constant 0 : index
    %61 = vector.load %arg9[%c12, %c0_36] : memref<32x128xf32, #tpu.memory_space<vmem>>, vector<1x128xf32>
    tpu.vector_store %arg9[%c12, %c0_36], %0 {strides = array<i32>} : memref<32x128xf32, #tpu.memory_space<vmem>>, vector<1x128xf32>,
    %c13 = arith.constant 13 : index
    %c0_37 = arith.constant 0 : index
    %62 = vector.load %arg9[%c13, %c0_37] : memref<32x128xf32, #tpu.memory_space<vmem>>, vector<1x128xf32>
    tpu.vector_store %arg9[%c13, %c0_37], %0 {strides = array<i32>} : memref<32x128xf32, #tpu.memory_space<vmem>>, vector<1x128xf32>,
    %c14 = arith.constant 14 : index
    %c0_38 = arith.constant 0 : index
    %63 = vector.load %arg9[%c14, %c0_38] : memref<32x128xf32, #tpu.memory_space<vmem>>, vector<1x128xf32>
    tpu.vector_store %arg9[%c14, %c0_38], %0 {strides = array<i32>} : memref<32x128xf32, #tpu.memory_space<vmem>>, vector<1x128xf32>,
    %c15 = arith.constant 15 : index
    %c0_39 = arith.constant 0 : index
    %64 = vector.load %arg9[%c15, %c0_39] : memref<32x128xf32, #tpu.memory_space<vmem>>, vector<1x128xf32>
    tpu.vector_store %arg9[%c15, %c0_39], %0 {strides = array<i32>} : memref<32x128xf32, #tpu.memory_space<vmem>>, vector<1x128xf32>,
    %65 = arith.index_cast %arg0 : i32 to index
    %c0_40 = arith.constant 0 : index
    %66 = memref.load %arg2[%65, %c0_40] : memref<1x12xi32, #tpu.memory_space<smem>>
    %67 = arith.index_cast %66 : i32 to index
    %c0_41 = arith.constant 0 : index
    %68 = vector.load %arg3[%67, %c0_41] : memref<56x128xf32, #tpu.memory_space<vmem>>, vector<1x128xf32>
    %c16 = arith.constant 16 : index
    %c0_42 = arith.constant 0 : index
    %69 = vector.load %arg9[%c16, %c0_42] : memref<32x128xf32, #tpu.memory_space<vmem>>, vector<1x128xf32>
    tpu.vector_store %arg9[%c16, %c0_42], %68 {strides = array<i32>} : memref<32x128xf32, #tpu.memory_space<vmem>>, vector<1x128xf32>,
    %70 = arith.index_cast %arg0 : i32 to index
    %c1_43 = arith.constant 1 : index
    %71 = memref.load %arg2[%70, %c1_43] : memref<1x12xi32, #tpu.memory_space<smem>>
    %72 = arith.index_cast %71 : i32 to index
    %c0_44 = arith.constant 0 : index
    %73 = vector.load %arg3[%72, %c0_44] : memref<56x128xf32, #tpu.memory_space<vmem>>, vector<1x128xf32>
    %c17 = arith.constant 17 : index
    %c0_45 = arith.constant 0 : index
    %74 = vector.load %arg9[%c17, %c0_45] : memref<32x128xf32, #tpu.memory_space<vmem>>, vector<1x128xf32>
    tpu.vector_store %arg9[%c17, %c0_45], %73 {strides = array<i32>} : memref<32x128xf32, #tpu.memory_space<vmem>>, vector<1x128xf32>,
    %75 = arith.index_cast %arg0 : i32 to index
    %c2_46 = arith.constant 2 : index
    %76 = memref.load %arg2[%75, %c2_46] : memref<1x12xi32, #tpu.memory_space<smem>>
    %77 = arith.index_cast %76 : i32 to index
    %c0_47 = arith.constant 0 : index
    %78 = vector.load %arg3[%77, %c0_47] : memref<56x128xf32, #tpu.memory_space<vmem>>, vector<1x128xf32>
    %c18 = arith.constant 18 : index
    %c0_48 = arith.constant 0 : index
    %79 = vector.load %arg9[%c18, %c0_48] : memref<32x128xf32, #tpu.memory_space<vmem>>, vector<1x128xf32>
    tpu.vector_store %arg9[%c18, %c0_48], %78 {strides = array<i32>} : memref<32x128xf32, #tpu.memory_space<vmem>>, vector<1x128xf32>,
    %80 = arith.index_cast %arg0 : i32 to index
    %c3_49 = arith.constant 3 : index
    %81 = memref.load %arg2[%80, %c3_49] : memref<1x12xi32, #tpu.memory_space<smem>>
    %82 = arith.index_cast %81 : i32 to index
    %c0_50 = arith.constant 0 : index
    %83 = vector.load %arg3[%82, %c0_50] : memref<56x128xf32, #tpu.memory_space<vmem>>, vector<1x128xf32>
    %c19 = arith.constant 19 : index
    %c0_51 = arith.constant 0 : index
    %84 = vector.load %arg9[%c19, %c0_51] : memref<32x128xf32, #tpu.memory_space<vmem>>, vector<1x128xf32>
    tpu.vector_store %arg9[%c19, %c0_51], %83 {strides = array<i32>} : memref<32x128xf32, #tpu.memory_space<vmem>>, vector<1x128xf32>,
    %85 = arith.index_cast %arg0 : i32 to index
    %c4_52 = arith.constant 4 : index
    %86 = memref.load %arg2[%85, %c4_52] : memref<1x12xi32, #tpu.memory_space<smem>>
    %87 = arith.index_cast %86 : i32 to index
    %c0_53 = arith.constant 0 : index
    %88 = vector.load %arg3[%87, %c0_53] : memref<56x128xf32, #tpu.memory_space<vmem>>, vector<1x128xf32>
    %c20 = arith.constant 20 : index
    %c0_54 = arith.constant 0 : index
    %89 = vector.load %arg9[%c20, %c0_54] : memref<32x128xf32, #tpu.memory_space<vmem>>, vector<1x128xf32>
    tpu.vector_store %arg9[%c20, %c0_54], %88 {strides = array<i32>} : memref<32x128xf32, #tpu.memory_space<vmem>>, vector<1x128xf32>,
    %90 = arith.index_cast %arg0 : i32 to index
    %c5_55 = arith.constant 5 : index
    %91 = memref.load %arg2[%90, %c5_55] : memref<1x12xi32, #tpu.memory_space<smem>>
    %92 = arith.index_cast %91 : i32 to index
    %c0_56 = arith.constant 0 : index
    %93 = vector.load %arg3[%92, %c0_56] : memref<56x128xf32, #tpu.memory_space<vmem>>, vector<1x128xf32>
    %c21 = arith.constant 21 : index
    %c0_57 = arith.constant 0 : index
    %94 = vector.load %arg9[%c21, %c0_57] : memref<32x128xf32, #tpu.memory_space<vmem>>, vector<1x128xf32>
    tpu.vector_store %arg9[%c21, %c0_57], %93 {strides = array<i32>} : memref<32x128xf32, #tpu.memory_space<vmem>>, vector<1x128xf32>,
    %95 = arith.index_cast %arg0 : i32 to index
    %c6_58 = arith.constant 6 : index
    %96 = memref.load %arg2[%95, %c6_58] : memref<1x12xi32, #tpu.memory_space<smem>>
    %97 = arith.index_cast %96 : i32 to index
    %c0_59 = arith.constant 0 : index
    %98 = vector.load %arg3[%97, %c0_59] : memref<56x128xf32, #tpu.memory_space<vmem>>, vector<1x128xf32>
    %c22 = arith.constant 22 : index
    %c0_60 = arith.constant 0 : index
    %99 = vector.load %arg9[%c22, %c0_60] : memref<32x128xf32, #tpu.memory_space<vmem>>, vector<1x128xf32>
    tpu.vector_store %arg9[%c22, %c0_60], %98 {strides = array<i32>} : memref<32x128xf32, #tpu.memory_space<vmem>>, vector<1x128xf32>,
    %100 = arith.index_cast %arg0 : i32 to index
    %c7_61 = arith.constant 7 : index
    %101 = memref.load %arg2[%100, %c7_61] : memref<1x12xi32, #tpu.memory_space<smem>>
    %102 = arith.index_cast %101 : i32 to index
    %c0_62 = arith.constant 0 : index
    %103 = vector.load %arg3[%102, %c0_62] : memref<56x128xf32, #tpu.memory_space<vmem>>, vector<1x128xf32>
    %c23 = arith.constant 23 : index
    %c0_63 = arith.constant 0 : index
    %104 = vector.load %arg9[%c23, %c0_63] : memref<32x128xf32, #tpu.memory_space<vmem>>, vector<1x128xf32>
    tpu.vector_store %arg9[%c23, %c0_63], %103 {strides = array<i32>} : memref<32x128xf32, #tpu.memory_space<vmem>>, vector<1x128xf32>,
    %105 = arith.index_cast %arg0 : i32 to index
    %c8_64 = arith.constant 8 : index
    %106 = memref.load %arg2[%105, %c8_64] : memref<1x12xi32, #tpu.memory_space<smem>>
    %107 = arith.index_cast %106 : i32 to index
    %c0_65 = arith.constant 0 : index
    %108 = vector.load %arg3[%107, %c0_65] : memref<56x128xf32, #tpu.memory_space<vmem>>, vector<1x128xf32>
    %c24 = arith.constant 24 : index
    %c0_66 = arith.constant 0 : index
    %109 = vector.load %arg9[%c24, %c0_66] : memref<32x128xf32, #tpu.memory_space<vmem>>, vector<1x128xf32>
    tpu.vector_store %arg9[%c24, %c0_66], %108 {strides = array<i32>} : memref<32x128xf32, #tpu.memory_space<vmem>>, vector<1x128xf32>,
    %110 = arith.index_cast %arg0 : i32 to index
    %c9_67 = arith.constant 9 : index
    %111 = memref.load %arg2[%110, %c9_67] : memref<1x12xi32, #tpu.memory_space<smem>>
    %112 = arith.index_cast %111 : i32 to index
    %c0_68 = arith.constant 0 : index
    %113 = vector.load %arg3[%112, %c0_68] : memref<56x128xf32, #tpu.memory_space<vmem>>, vector<1x128xf32>
    %c25 = arith.constant 25 : index
    %c0_69 = arith.constant 0 : index
    %114 = vector.load %arg9[%c25, %c0_69] : memref<32x128xf32, #tpu.memory_space<vmem>>, vector<1x128xf32>
    tpu.vector_store %arg9[%c25, %c0_69], %113 {strides = array<i32>} : memref<32x128xf32, #tpu.memory_space<vmem>>, vector<1x128xf32>,
    %115 = arith.index_cast %arg0 : i32 to index
    %c10_70 = arith.constant 10 : index
    %116 = memref.load %arg2[%115, %c10_70] : memref<1x12xi32, #tpu.memory_space<smem>>
    %117 = arith.index_cast %116 : i32 to index
    %c0_71 = arith.constant 0 : index
    %118 = vector.load %arg3[%117, %c0_71] : memref<56x128xf32, #tpu.memory_space<vmem>>, vector<1x128xf32>
    %c26 = arith.constant 26 : index
    %c0_72 = arith.constant 0 : index
    %119 = vector.load %arg9[%c26, %c0_72] : memref<32x128xf32, #tpu.memory_space<vmem>>, vector<1x128xf32>
    tpu.vector_store %arg9[%c26, %c0_72], %118 {strides = array<i32>} : memref<32x128xf32, #tpu.memory_space<vmem>>, vector<1x128xf32>,
    %120 = arith.index_cast %arg0 : i32 to index
    %c11_73 = arith.constant 11 : index
    %121 = memref.load %arg2[%120, %c11_73] : memref<1x12xi32, #tpu.memory_space<smem>>
    %122 = arith.index_cast %121 : i32 to index
    %c0_74 = arith.constant 0 : index
    %123 = vector.load %arg3[%122, %c0_74] : memref<56x128xf32, #tpu.memory_space<vmem>>, vector<1x128xf32>
    %c27 = arith.constant 27 : index
    %c0_75 = arith.constant 0 : index
    %124 = vector.load %arg9[%c27, %c0_75] : memref<32x128xf32, #tpu.memory_space<vmem>>, vector<1x128xf32>
    tpu.vector_store %arg9[%c27, %c0_75], %123 {strides = array<i32>} : memref<32x128xf32, #tpu.memory_space<vmem>>, vector<1x128xf32>,
    %c28 = arith.constant 28 : index
    %c0_76 = arith.constant 0 : index
    %125 = vector.load %arg9[%c28, %c0_76] : memref<32x128xf32, #tpu.memory_space<vmem>>, vector<1x128xf32>
    tpu.vector_store %arg9[%c28, %c0_76], %0 {strides = array<i32>} : memref<32x128xf32, #tpu.memory_space<vmem>>, vector<1x128xf32>,
    %c29 = arith.constant 29 : index
    %c0_77 = arith.constant 0 : index
    %126 = vector.load %arg9[%c29, %c0_77] : memref<32x128xf32, #tpu.memory_space<vmem>>, vector<1x128xf32>
    tpu.vector_store %arg9[%c29, %c0_77], %0 {strides = array<i32>} : memref<32x128xf32, #tpu.memory_space<vmem>>, vector<1x128xf32>,
    %c30 = arith.constant 30 : index
    %c0_78 = arith.constant 0 : index
    %127 = vector.load %arg9[%c30, %c0_78] : memref<32x128xf32, #tpu.memory_space<vmem>>, vector<1x128xf32>
    tpu.vector_store %arg9[%c30, %c0_78], %0 {strides = array<i32>} : memref<32x128xf32, #tpu.memory_space<vmem>>, vector<1x128xf32>,
    %c31 = arith.constant 31 : index
    %c0_79 = arith.constant 0 : index
    %128 = vector.load %arg9[%c31, %c0_79] : memref<32x128xf32, #tpu.memory_space<vmem>>, vector<1x128xf32>
    tpu.vector_store %arg9[%c31, %c0_79], %0 {strides = array<i32>} : memref<32x128xf32, #tpu.memory_space<vmem>>, vector<1x128xf32>,
    %c0_80 = arith.constant 0 : index
    %c0_81 = arith.constant 0 : index
    %129 = vector.load %arg9[%c0_80, %c0_81] : memref<32x128xf32, #tpu.memory_space<vmem>>, vector<32x128xf32>
    %130 = arith.truncf %129 : vector<32x128xf32> to vector<32x128xbf16>
    %c0_82 = arith.constant 0 : index
    %c0_83 = arith.constant 0 : index
    %131 = vector.load %arg4[%c0_82, %c0_83] : memref<128x128xbf16, #tpu.memory_space<vmem>>, vector<128x128xbf16>
    %cst_84 = arith.constant dense<0.000000e+00> : vector<32x128xf32>
    %132 = tpu.matmul %130, %131, %cst_84 {dimension_numbers = #tpu.dot_dimension_numbers<[1], [0], [0], [1], [0, 0, 1, 1], [], []>} : vector<32x128xbf16>, vector<128x128xbf16>, vector<32x128xf32> -> vector<32x128xf32>
    %c0_85 = arith.constant 0 : index
    %c0_86 = arith.constant 0 : index
    %133 = vector.load %arg5[%c0_85, %c0_86] : memref<1x128xf32, #tpu.memory_space<vmem>>, vector<1x128xf32>
    %134 = vector.broadcast %133 : vector<1x128xf32> to vector<32x128xf32>
    %135 = arith.addf %132, %134 : vector<32x128xf32>
    %cst_87 = arith.constant 0.000000e+00 : f32
    %136 = vector.broadcast %cst_87 : f32 to vector<32x128xf32>
    %137 = arith.maximumf %135, %136 : vector<32x128xf32>
    %138 = arith.truncf %137 : vector<32x128xf32> to vector<32x128xbf16>
    %c0_88 = arith.constant 0 : index
    %c0_89 = arith.constant 0 : index
    %139 = vector.load %arg6[%c0_88, %c0_89] : memref<128x128xbf16, #tpu.memory_space<vmem>>, vector<128x128xbf16>
    %cst_90 = arith.constant dense<0.000000e+00> : vector<32x128xf32>
    %140 = tpu.matmul %138, %139, %cst_90 {dimension_numbers = #tpu.dot_dimension_numbers<[1], [0], [0], [1], [0, 0, 1, 1], [], []>} : vector<32x128xbf16>, vector<128x128xbf16>, vector<32x128xf32> -> vector<32x128xf32>
    %c0_91 = arith.constant 0 : index
    %c0_92 = arith.constant 0 : index
    %141 = vector.load %arg7[%c0_91, %c0_92] : memref<1x128xf32, #tpu.memory_space<vmem>>, vector<1x128xf32>
    %142 = vector.broadcast %141 : vector<1x128xf32> to vector<32x128xf32>
    %143 = arith.addf %140, %142 : vector<32x128xf32>
    %144 = tpu.iota {dimensions = array<i32: 0>} : vector<128x16xi32>
    %145 = tpu.iota {dimensions = array<i32: 1>} : vector<128x16xi32>
    %c3_i32 = arith.constant 3 : i32
    %146 = vector.broadcast %c3_i32 : i32 to vector<128x16xi32>
    %147 = arith.cmpi slt, %144, %146 : vector<128x16xi32>
    %c4_i32 = arith.constant 4 : i32
    %148 = vector.broadcast %c4_i32 : i32 to vector<128x16xi32>
    %149 = arith.muli %144, %148 : vector<128x16xi32>
    %150 = arith.cmpi sge, %145, %149 : vector<128x16xi32>
    %151 = arith.andi %147, %150 : vector<128x16xi1>
    %c1_i32 = arith.constant 1 : i32
    %152 = vector.broadcast %c1_i32 : i32 to vector<128x16xi32>
    %153 = arith.addi %144, %152 : vector<128x16xi32>
    %c4_i32_93 = arith.constant 4 : i32
    %154 = vector.broadcast %c4_i32_93 : i32 to vector<128x16xi32>
    %155 = arith.muli %153, %154 : vector<128x16xi32>
    %156 = arith.cmpi slt, %145, %155 : vector<128x16xi32>
    %157 = arith.andi %151, %156 : vector<128x16xi1>
    %cst_94 = arith.constant 2.500000e-01 : f32
    %cst_95 = arith.constant 0.000000e+00 : f32
    %158 = vector.broadcast %cst_94 : f32 to vector<128x16xf32>
    %159 = vector.broadcast %cst_95 : f32 to vector<128x16xf32>
    %160 = arith.select %157, %158, %159 : vector<128x16xi1>, vector<128x16xf32>
    %161 = vector.extract_strided_slice %143 {offsets = [0, 0], sizes = [16, 128], strides = [1, 1]} : vector<32x128xf32> to vector<16x128xf32>
    %cst_96 = arith.constant dense<0.000000e+00> : vector<128x128xf32>
    %162 = tpu.matmul %160, %161, %cst_96 {dimension_numbers = #tpu.dot_dimension_numbers<[1], [0], [0], [1], [0, 0, 1, 1], [], []>} : vector<128x16xf32>, vector<16x128xf32>, vector<128x128xf32> -> vector<128x128xf32>
    %163 = vector.extract_strided_slice %143 {offsets = [16, 0], sizes = [16, 128], strides = [1, 1]} : vector<32x128xf32> to vector<16x128xf32>
    %164 = arith.mulf %163, %163 : vector<16x128xf32>
    %cst_97 = arith.constant dense<0.000000e+00> : vector<16xf32>
    %165 = vector.multi_reduction <add>, %164, %cst_97 [1] : vector<16x128xf32> to vector<16xf32>
    %166 = vector.shape_cast %165 : vector<16xf32> to vector<16x1xf32>
    %167 = arith.mulf %162, %162 : vector<128x128xf32>
    %cst_98 = arith.constant dense<0.000000e+00> : vector<128xf32>
    %168 = vector.multi_reduction <add>, %167, %cst_98 [1] : vector<128x128xf32> to vector<128xf32>
    %169 = vector.shape_cast %168 : vector<128xf32> to vector<128x1xf32>
    %170 = arith.truncf %163 : vector<16x128xf32> to vector<16x128xbf16>
    %171 = arith.truncf %162 : vector<128x128xf32> to vector<128x128xbf16>
    %cst_99 = arith.constant dense<0.000000e+00> : vector<16x128xf32>
    %172 = tpu.matmul %170, %171, %cst_99 {dimension_numbers = #tpu.dot_dimension_numbers<[1], [1], [0], [0], [0, 0, 1, 0], [], []>} : vector<16x128xbf16>, vector<128x128xbf16>, vector<16x128xf32> -> vector<16x128xf32>
    %173 = tpu.transpose %169, [1, 0] : vector<128x1xf32> -> vector<1x128xf32>
    %174 = vector.broadcast %166 : vector<16x1xf32> to vector<16x128xf32>
    %175 = vector.broadcast %173 : vector<1x128xf32> to vector<16x128xf32>
    %176 = arith.addf %174, %175 : vector<16x128xf32>
    %cst_100 = arith.constant 2.000000e+00 : f32
    %177 = vector.broadcast %cst_100 : f32 to vector<16x128xf32>
    %178 = arith.mulf %177, %172 : vector<16x128xf32>
    %179 = arith.subf %176, %178 : vector<16x128xf32>
    %cst_101 = arith.constant 9.99999993E-9 : f32
    %180 = vector.broadcast %cst_101 : f32 to vector<16x128xf32>
    %181 = arith.maximumf %179, %180 : vector<16x128xf32>
    %182 = math.sqrt %181 : vector<16x128xf32>
    %cst_102 = arith.constant 0.000000e+00 : f32
    %183 = vector.broadcast %cst_102 : f32 to vector<16x128xf32>
    %184 = arith.subf %183, %182 : vector<16x128xf32>
    %c0_103 = arith.constant 0 : index
    %c0_104 = arith.constant 0 : index
    %c0_105 = arith.constant 0 : index
    %185 = vector.load %arg8[%c0_103, %c0_104, %c0_105] : memref<1x16x128xf32, #tpu.memory_space<vmem>>, vector<1x16x128xf32>
    %186 = vector.shape_cast %185 : vector<1x16x128xf32> to vector<16x128xf32>
    %187 = vector.shape_cast %184 : vector<16x128xf32> to vector<1x16x128xf32>
    tpu.vector_store %arg8[%c0_103, %c0_104, %c0_105], %187 {strides = array<i32>} : memref<1x16x128xf32, #tpu.memory_space<vmem>>, vector<1x16x128xf32>,
    return
  }
  func.func @transform_0(%arg0: i32, %arg1: memref<1x12xi32, #tpu.memory_space<smem>>, %arg2: memref<1x12xi32, #tpu.memory_space<smem>>) -> (i32, i32) {
    %c0_i32 = arith.constant 0 : i32
    %c0_i32_0 = arith.constant 0 : i32
    %c0_i32_1 = arith.constant 0 : i32
    return %c0_i32, %c0_i32_0 : i32, i32
  }
  func.func @transform_1(%arg0: i32, %arg1: memref<1x12xi32, #tpu.memory_space<smem>>, %arg2: memref<1x12xi32, #tpu.memory_space<smem>>) -> (i32, i32) {
    %c0_i32 = arith.constant 0 : i32
    %c0_i32_0 = arith.constant 0 : i32
    %c0_i32_1 = arith.constant 0 : i32
    return %c0_i32, %c0_i32_0 : i32, i32
  }
  func.func @transform_2(%arg0: i32, %arg1: memref<1x12xi32, #tpu.memory_space<smem>>, %arg2: memref<1x12xi32, #tpu.memory_space<smem>>) -> (i32, i32) {
    %c0_i32 = arith.constant 0 : i32
    %c0_i32_0 = arith.constant 0 : i32
    %c0_i32_1 = arith.constant 0 : i32
    return %c0_i32, %c0_i32_0 : i32, i32
  }
  func.func @transform_3(%arg0: i32, %arg1: memref<1x12xi32, #tpu.memory_space<smem>>, %arg2: memref<1x12xi32, #tpu.memory_space<smem>>) -> (i32, i32) {
    %c0_i32 = arith.constant 0 : i32
    %c0_i32_0 = arith.constant 0 : i32
    %c0_i32_1 = arith.constant 0 : i32
    return %c0_i32, %c0_i32_0 : i32, i32
  }
  func.func @transform_4(%arg0: i32, %arg1: memref<1x12xi32, #tpu.memory_space<smem>>, %arg2: memref<1x12xi32, #tpu.memory_space<smem>>) -> (i32, i32) {
    %c0_i32 = arith.constant 0 : i32
    %c0_i32_0 = arith.constant 0 : i32
    %c0_i32_1 = arith.constant 0 : i32
    return %c0_i32, %c0_i32_0 : i32, i32
  }
  func.func @transform_5(%arg0: i32, %arg1: memref<1x12xi32, #tpu.memory_space<smem>>, %arg2: memref<1x12xi32, #tpu.memory_space<smem>>) -> (i32, i32, i32) {
    %c0_i32 = arith.constant 0 : i32
    %c0_i32_0 = arith.constant 0 : i32
    %c0_i32_1 = arith.constant 0 : i32
    return %arg0, %c0_i32, %c0_i32_0 : i32, i32, i32
  }
}

</mosaic_0001>

<bundles_post_ra>
// kernel: _episodes_forward.1
= control target key start
LH: loop header
LB: loop body
LE: loop exit
PB: predicated region body
PF: predicated region fallthrough
CT: control target
= control target key end

     0   :  { %s1573_s0 = inlined_call_operand.vmem [shape: s32[1,12], index: 0, kind: input, shape index: {}]   ;;  %s1574_s2 = inlined_call_operand.hbm [shape: f32[56,128], index: 2, kind: input, shape index: {}]   ;;  %s1575_s3 = inlined_call_operand.hbm [shape: bf16[128,128], index: 3, kind: input, shape index: {}]   ;;  %s1576_s4 = inlined_call_operand.vmem [shape: f32[1,128], index: 4, kind: input, shape index: {}]   ;;  %s1577_s5 = inlined_call_operand.hbm [shape: bf16[128,128], index: 5, kind: input, shape index: {}]   ;;  %s1578_s6 = inlined_call_operand.vmem [shape: f32[1,128], index: 6, kind: input, shape index: {}]   ;;  %s1579_s7 = inlined_call_operand.hbm [shape: f32[1,16,128], index: 7, kind: output, shape index: {}]   ;;  %s1580_s1 = inlined_call_operand.vmem [shape: s32[1,12], index: 1, kind: input, shape index: {}]  }
   0x1   :  { %s12_s26 = sshll.u32 %s1573_s0, 4  ;;  %s16_s29 = sshll.u32 %s1580_s1, 4  ;;  %s13_s26 = int_to_ptr.vmem [resolvable:$true] %s12_s26  ;;  %s17_s29 = int_to_ptr.vmem [resolvable:$true] %s16_s29 }
   0x2   :  { %s1220_s30 = scalar_lea.vmem %s13_s26, 16  ;;  %p1225_p1 = scmp.lt.s32.totalorder %s13_s26, %s13_s26 }
   0x3   :  { %p1221_p0 = scmp.ne.s32.totalorder %s13_s26, %s1220_s30  ;;  %p1226_p2 = scmp.lt.s32.totalorder %s1220_s30, %s1220_s30 }
   0x5   :  { %p1227_p3 = por %p1226_p2, %p1225_p1 }
   0x7   :  { %p1228_p4 = pnand %p1227_p3, %p1221_p0 }
   0x9   :  { %1231 = shalt.err (!%p1228_p4)  }
   0xa   :  { %s1340_s8 = smov [#allocation4]   ;;  %s1232_s9 = scalar_lea.vmem %s17_s29, 16 }
   0xb   :  { %15 = dma.vmem_to_smem %s13_s26, 16, %s1340_s8, [#allocation3] }
   0xc   :  { %p1233_p5 = scmp.ne.s32.totalorder %s17_s29, %s1232_s9  ;;  %p1237_p6 = scmp.lt.s32.totalorder %s17_s29, %s17_s29 }
   0xd   :  { %p1238_p7 = scmp.lt.s32.totalorder %s1232_s9, %s1232_s9 }
   0xf   :  { %p1239_p8 = por %p1238_p7, %p1237_p6 }
  0x11   :  { %p1240_p9 = pnand %p1239_p8, %p1233_p5 }
  0x13   :  { %1243 = shalt.err (!%p1240_p9)  }
  0x14   :  { %s1341_s0 = smov [#allocation5]  }
  0x15   :  { %19 = dma.vmem_to_smem %s17_s29, 16, %s1341_s0, [#allocation3] }
  0x16   :  { %1332 = dma.done.wait [#allocation3], 32 }
  0x17   :  { %1333 = vsyncadd [#allocation3], 4294967264 }
  0x18   :  { %21 = sfence }
  0x19   :  { %22 = vsyncpa [#allocation7], 0 }
  0x1a   :  { %23 = vsyncpa [#allocation10], 0 }
  0x1b   :  { %24 = vsyncpa [#allocation8], 0  ;;  %s1342_s1 = smov [#allocation9]   ;;  %s1244_s13 = scalar_lea.hbm %s1575_s3, 1024 }
  0x1c   :  { %s42_s10 = sshll.u32 %s1342_s1, 4  ;;  %p1245_p10 = scmp.ne.s32.totalorder %s1575_s3, %s1244_s13  ;;  %s43_s10 = int_to_ptr.vmem [resolvable:$true] %s42_s10 }
  0x1d   :  { %p1248_p11 = scmp.lt.u32.totalorder %s1244_s13, %s1575_s3 }
  0x1f   :  { %p1250_p12 = pnand %p1248_p11, %p1245_p10 }
  0x21   :  { %1253 = shalt.err (!%p1250_p12)
}
  0x22   :  { %s1254_s18 = scalar_lea.vmem %s43_s10, 1024  ;;  %p1259_p0 = scmp.lt.s32.totalorder %s43_s10, %s43_s10 }
  0x23   :  { %p1255_p13 = scmp.ne.s32.totalorder %s43_s10, %s1254_s18  ;;  %p1260_p1 = scmp.lt.s32.totalorder %s1254_s18, %s1254_s18 }
  0x25   :  { %p1261_p2 = por %p1260_p1, %p1259_p0 }
  0x27   :  { %p1262_p3 = pnand %p1261_p2, %p1255_p13 }
  0x29   :  { %1265 = shalt.err (!%p1262_p3)
}
  0x2a   :  { %s1343_s19 = smov 64   ;;  %s1344_s20 = smov 4  }
  0x2b   :  { %48 = dma.hbm_to_vmem [thread:$0]  %s1575_s3, 1024, %s43_s10, [#allocation10], %s1343_s19, %s1343_s19, %s1344_s20  }
  0x2c   :  { %s1345_s23 = smov [#allocation6]   ;;  %s1266_s27 = scalar_lea.hbm %s1574_s2, 896 }
  0x2d   :  { %s30_s24 = sshll.u32 %s1345_s23, 4  ;;  %p1267_p4 = scmp.ne.s32.totalorder %s1574_s2, %s1266_s27  ;;  %s31_s24 = int_to_ptr.vmem [resolvable:$true] %s30_s24 }
  0x2e   :  { %p1270_p5 = scmp.lt.u32.totalorder %s1266_s27, %s1574_s2 }
  0x30   :  { %p1272_p6 = pnand %p1270_p5, %p1267_p4 }
  0x32   :  { %1275 = shalt.err (!%p1272_p6)
}
  0x33   :  { %s1276_s9 = scalar_lea.vmem %s31_s24, 896  ;;  %p1281_p8 = scmp.lt.s32.totalorder %s31_s24, %s31_s24 }
  0x34   :  { %p1277_p7 = scmp.ne.s32.totalorder %s31_s24, %s1276_s9  ;;  %p1282_p9 = scmp.lt.s32.totalorder %s1276_s9, %s1276_s9 }
  0x36   :  { %p1283_p10 = por %p1282_p9, %p1281_p8 }
  0x38   :  { %p1284_p11 = pnand %p1283_p10, %p1277_p7 }
  0x3a   :  { %1287 = shalt.err (!%p1284_p11)
}
  0x3b   :  { %s1346_s3 = smov 128   ;;  %s1347_s0 = smov 8  }
  0x3c   :  { %36 = dma.hbm_to_vmem [thread:$0]  %s1574_s2, 896, %s31_s24, [#allocation7], %s1346_s3, %s1346_s3, %s1347_s0  }
  0x3d   :  { %s1348_s11 = smov [#allocation11]   ;;  %s1288_s15 = scalar_lea.hbm %s1577_s5, 1024 }
  0x3e   :  { %s56_s12 = sshll.u32 %s1348_s11, 4  ;;  %p1289_p12 = scmp.ne.s32.totalorder %s1577_s5, %s1288_s15  ;;  %s57_s12 = int_to_ptr.vmem [resolvable:$true] %s56_s12 }
  0x3f   :  { %p1292_p13 = scmp.lt.u32.totalorder %s1288_s15, %s1577_s5 }
  0x41   :  { %p1294_p0 = pnand %p1292_p13, %p1289_p12 }
  0x43   :  { %1297 = shalt.err (!%p1294_p0)
}
  0x44   :  { %s1298_s22 = scalar_lea.vmem %s57_s12, 1024  ;;  %p1303_p2 = scmp.lt.s32.totalorder %s57_s12, %s57_s12 }
  0x45   :  { %p1299_p1 = scmp.ne.s32.totalorder %s57_s12, %s1298_s22  ;;  %p1304_p3 = scmp.lt.s32.totalorder %s1298_s22, %s1298_s22 }
  0x47   :  { %p1305_p4 = por %p1304_p3, %p1303_p2 }
  0x49   :  { %p1306_p5 = pnand %p1305_p4, %p1299_p1 }
  0x4b   :  { %1309 = shalt.err (!%p1306_p5)
}
  0x4c   :  { %62 = dma.hbm_to_vmem [thread:$0]  %s1577_s5, 1024, %s57_s12, [#allocation10], %s1343_s19, %s1343_s19, %s1344_s20  }
  0x4d   :  { %1334 = dma.done.wait [#allocation7], 896  }
  0x4e   :  { %1335 = vsyncadd [#allocation7], 4294966400 }
  0x4f   :  { %1336 = dma.done.wait [#allocation10], 2048  }
  0x50   :  { %1337 = vsyncadd [#allocation10], 4294965248  ;;  %s1443_s24 = sld [smem:[#allocation4]]  ;;  %v1349_v0 = vmov 0.0   ;;  %s1008_s5 = sld [smem:[#allocation4 + $0x1]]  ;;  %v1200_v1 = vld [vmem:[#allocation9] sm:$0xff]   ;;  %v443_v62 = vlaneseq }
  0x51   :  { %135 = vst [vmem:[#allocation2 + $0xc] sm:$0x1] %v1349_v0  ;;  %136 = vst [vmem:[#allocation2 + $0xd] sm:$0x1] %v1349_v0  ;;  %s1009_s19 = sld [smem:[#allocation4 + $0x2]]  ;;  %s1010_s20 = sld [smem:[#allocation4 + $0x3]]  ;;  %1096 = vmatprep.subr.bf16.mxu0 %v1200_v1 }
  0x52   :  { %137 = vst [vmem:[#allocation2 + $0xe] sm:$0x1] %v1349_v0  ;;  %138 = vst [vmem:[#allocation2 + $0xf] sm:$0x1] %v1349_v0  ;;  %s1453_s25 = sld [smem:[#allocation4 + $0x4]]  ;;  %s1455_s26 = sld [smem:[#allocation4 + $0x5]]  ;;  %1097 = vmatpush3.bf16.msra.mxu0 %v1200_v1 }
  0x53   :  { %187 = vst [vmem:[#allocation2 + $0x1c] sm:$0x1] %v1349_v0  ;;  %188 = vst [vmem:[#allocation2 + $0x1d] sm:$0x1] %v1349_v0  ;;  %s1457_s27 = sld [smem:[#allocation4 + $0x6]]  ;;  %s1459_s28 = sld [smem:[#allocation4 + $0x7]] }
  0x54   :  { %189 = vst [vmem:[#allocation2 + $0x1e] sm:$0x1] %v1349_v0  ;;  %190 = vst [vmem:[#allocation2 + $0x1f] sm:$0x1] %v1349_v0  ;;  %s1461_s29 = sld [smem:[#allocation4 + $0x8]]  ;;  %s1463_s30 = sld [smem:[#allocation4 + $0x9]] }
  0x55   :  { %s1465_s8 = sld [smem:[#allocation4 + $0xa]]  ;;  %v1201_v2 = vld [vmem:[#allocation9 + $0x8] sm:$0xff]   ;;  %s1467_s9 = sld [smem:[#allocation4 + $0xb]]  ;;  %v1202_v3 = vld [vmem:[#allocation9 + $0x10] sm:$0xff]   ;;  %v1203_v4 = vld [vmem:[#allocation9 + $0x18] sm:$0xff]   ;;  %v1512_v63 = vshrl.u32 %v443_v62, 7 }
  0x56   :  { %1098 = vmatprep.subr.bf16.mxu0 %v1201_v2  ;;  %s77_s1 = scalar_lea.vmem [#allocation6], %s1443_s24  ;;  %s82_s10 = scalar_lea.vmem [#allocation6], %s1008_s5  ;;  %v1204_v11 = vld [vmem:[#allocation9 + $0x20] sm:$0xff]   ;;  %v1205_v18 = vld [vmem:[#allocation9 + $0x28] sm:$0xff]   ;;  %v1206_v21 = vld [vmem:[#allocation9 + $0x30] sm:$0xff]   ;;  %vm606_vm5 = vcmask 130048  }
  0x57   :  { %1099 = vmatpush3.bf16.msra.mxu0 %v1201_v2  ;;  %v78_v5 = vld [vmem:[%s77_s1] sm:$0x1]  ;;  %s87_s11 = scalar_lea.vmem [#allocation6], %s1009_s19  ;;  %s92_s12 = scalar_lea.vmem [#allocation6], %s1010_s20  ;;  %v1208_v19 = vld [vmem:[#allocation11] sm:$0xff]   ;;  %v1210_v29 = vld [vmem:[#allocation11 + $0x10] sm:$0xff]  }
  0x58   :  { %1100 = vmatprep.subr.bf16.mxu0 %v1202_v3  ;;  %v83_v6 = vld [vmem:[%s82_s10] sm:$0x1]  ;;  %79 = vst [vmem:[#allocation2] sm:$0x1] %v78_v5  ;;  %s97_s13 = scalar_lea.vmem [#allocation6], %s1453_s25  ;;  %s102_s14 = scalar_lea.vmem [#allocation6], %s1455_s26  ;;  %1116 = vmatprep.subr.bf16.mxu1 %v1208_v19 }
  0x59   :  { %v88_v7 = vld [vmem:[%s87_s11] sm:$0x1]  ;;  %84 = vst [vmem:[#allocation2 + $0x1] sm:$0x1] %v83_v6  ;;  %s107_s15 = scalar_lea.vmem [#allocation6], %s1457_s27  ;;  %s112_s16 = scalar_lea.vmem [#allocation6], %s1459_s28  ;;  %1117 = vmatpush3.bf16.msra.mxu1 %v1208_v19 }
  0x5a   :  { %89 = vst [vmem:[#allocation2 + $0x2] sm:$0x1] %v88_v7  ;;  %v93_v8 = vld [vmem:[%s92_s12] sm:$0x1]  ;;  %s117_s17 = scalar_lea.vmem [#allocation6], %s1461_s29  ;;  %s122_s18 = scalar_lea.vmem [#allocation6], %s1463_s30 }
  0x5b   :  { %v98_v9 = vld [vmem:[%s97_s13] sm:$0x1]  ;;  %94 = vst [vmem:[#allocation2 + $0x3] sm:$0x1] %v93_v8  ;;  %1101 = vmatpush3.bf16.msra.mxu0 %v1202_v3  ;;  %s127_s21 = scalar_lea.vmem [#allocation6], %s1465_s8  ;;  %s132_s22 = scalar_lea.vmem [#allocation6], %s1467_s9 }
  0x5c   :  { %v103_v10 = vld [vmem:[%s102_s14] sm:$0x1]  ;;  %99 = vst [vmem:[#allocation2 + $0x4] sm:$0x1] %v98_v9  ;;  %1102 = vmatprep.subr.bf16.mxu0 %v1203_v4  ;;  %s139_s2 = sld [smem:[#allocation5]]  ;;  %s1019_s23 = sld [smem:[#allocation5 + $0x1]] }
  0x5d   :  { %104 = vst [vmem:[#allocation2 + $0x5] sm:$0x1] %v103_v10  ;;  %v108_v12 = vld [vmem:[%s107_s15] sm:$0x1]  ;;  %s1478_s24 = sld [smem:[#allocation5 + $0x2]]  ;;  %s1480_s5 = sld [smem:[#allocation5 + $0x3]] }
  0x5e   :  { %v113_v13 = vld [vmem:[%s112_s16] sm:$0x1]  ;;  %109 = vst [vmem:[#allocation2 + $0x6] sm:$0x1] %v108_v12  ;;  %s1482_s19 = sld [smem:[#allocation5 + $0x4]]  ;;  %s1484_s20 = sld [smem:[#allocation5 + $0x5]] }
  0x5f   :  { %114 = vst [vmem:[#allocation2 + $0x7] sm:$0x1] %v113_v13  ;;  %v118_v14 = vld [vmem:[%s117_s17] sm:$0x1]  ;;  %1103 = vmatpush3.bf16.msra.mxu0 %v1203_v4  ;;  %s1486_s25 = sld [smem:[#allocation5 + $0x6]]  ;;  %s1488_s26 = sld [smem:[#allocation5 + $0x7]] }
  0x60   :  { %v123_v15 = vld [vmem:[%s122_s18] sm:$0x1]  ;;  %119 = vst [vmem:[#allocation2 + $0x8] sm:$0x1] %v118_v14  ;;  %1104 = vmatprep.subr.bf16.mxu0 %v1204_v11  ;;  %s1490_s27 = sld [smem:[#allocation5 + $0x8]]  ;;  %s1492_s28 = sld [smem:[#allocation5 + $0x9]] }
  0x61   :  { %124 = vst [vmem:[#allocation2 + $0x9] sm:$0x1] %v123_v15  ;;  %v128_v16 = vld [vmem:[%s127_s21] sm:$0x1]  ;;  %s1494_s29 = sld [smem:[#allocation5 + $0xa]]  ;;  %s1496_s30 = sld [smem:[#allocation5 + $0xb]] }
  0x62   :  { %v133_v17 = vld [vmem:[%s132_s22] sm:$0x1]  ;;  %129 = vst [vmem:[#allocation2 + $0xa] sm:$0x1] %v128_v16  ;;  %s140_s8 = scalar_lea.vmem [#allocation6], %s139_s2  ;;  %s144_s9 = scalar_lea.vmem [#allocation6], %s1019_s23 }
  0x63   :  { %134 = vst [vmem:[#allocation2 + $0xb] sm:$0x1] %v133_v17  ;;  %v1209_v20 = vld [vmem:[#allocation11 + $0x8] sm:$0xff]   ;;  %1105 = vmatpush3.bf16.msra.mxu0 %v1204_v11  ;;  %s148_s1 = scalar_lea.vmem [#allocation6], %s1478_s24  ;;  %s152_s10 = scalar_lea.vmem [#allocation6], %s1480_s5  ;;  %v1211_v30 = vld [vmem:[#allocation11 + $0x18] sm:$0xff]  }
  0x64   :  { %v141_v23 = vld [vmem:[%s140_s8] sm:$0x1]  ;;  %1118 = vmatprep.subr.bf16.mxu1 %v1209_v20  ;;  %1106 = vmatprep.subr.bf16.mxu0 %v1205_v18  ;;  %v1207_v31 = vld [vmem:[#allocation9 + $0x38] sm:$0xff]   ;;  %s156_s11 = scalar_lea.vmem [#allocation6], %s1482_s19  ;;  %s160_s12 = scalar_lea.vmem [#allocation6], %s1484_s20  ;;  %v1212_v40 = vld [vmem:[#allocation11 + $0x20] sm:$0xff]  }
  0x65   :  { %142 = vst [vmem:[#allocation2 + $0x10] sm:$0x1] %v141_v23  ;;  %v145_v25 = vld [vmem:[%s144_s9] sm:$0x1]  ;;  %1119 = vmatpush3.bf16.msra.mxu1 %v1209_v20  ;;  %s164_s13 = scalar_lea.vmem [#allocation6], %s1486_s25  ;;  %s168_s14 = scalar_lea.vmem [#allocation6], %s1488_s26 }
  0x66   :  { %v191_v22 = vld [vmem:[#allocation2] sm:$0xff]  ;;  %146 = vst [vmem:[#allocation2 + $0x11] sm:$0x1] %v145_v25  ;;  %s172_s15 = scalar_lea.vmem [#allocation6], %s1490_s27  ;;  %s176_s16 = scalar_lea.vmem [#allocation6], %s1492_s28  ;;  %1120 = vmatprep.subr.bf16.mxu1 %v1210_v29  ;;  %v1214_v45 = vld [vmem:[#allocation11 + $0x30] sm:$0xff]  }
  0x67   :  { %v149_v26 = vld [vmem:[%s148_s1] sm:$0x1]  ;;  %1107 = vmatpush3.bf16.msra.mxu0 %v1205_v18  ;;  %s180_s17 = scalar_lea.vmem [#allocation6], %s1494_s29  ;;  %s184_s18 = scalar_lea.vmem [#allocation6], %s1496_s30  ;;  %v1215_v46 = vld [vmem:[#allocation11 + $0x38] sm:$0xff]   ;;  %v526_v1 = vadd.s32 1, %v1512_v63 }
  0x68   :  { %150 = vst [vmem:[#allocation2 + $0x12] sm:$0x1] %v149_v26  ;;  %v153_v28 = vld [vmem:[%s152_s10] sm:$0x1]  ;;  %1108 = vmatprep.subr.bf16.mxu0 %v1206_v21  ;;  %v461_v2 = vand.u32 127, %v443_v62  ;;  %v478_v3 = vmul.u32 4, %v1512_v63 }
  0x69   :  { %154 = vst [vmem:[#allocation2 + $0x13] sm:$0x1] %v153_v28  ;;  %v157_v32 = vld [vmem:[%s156_s11] sm:$0x1]  ;;  %1121 = vmatpush3.bf16.msra.mxu1 %v1210_v29  ;;  %v542_v4 = vmul.u32 4, %v526_v1  ;;  %vm462_vm0 = vcmp.lt.s32.totalorder %v1512_v63, 3 }
  0x6a   :  { %v192_v24 = vld [vmem:[#allocation2 + $0x8] sm:$0xff]  ;;  %v161_v33 = vld [vmem:[%s160_s12] sm:$0x1]  ;;  %158 = vst [vmem:[#allocation2 + $0x14] sm:$0x1] %v157_v32  ;;  %1122 = vmatprep.subr.bf16.mxu1 %v1211_v30  ;;  %vm494_vm1 = vcmp.ge.s32.totalorder %v461_v2, %v478_v3  ;;  %vm1350_vm6 = vmmov 0  }
  0x6b   :  { %v195_v27 = vpack.c.bf16 %v192_v24, %v191_v22  ;;  %162 = vst [vmem:[#allocation2 + $0x15] sm:$0x1] %v161_v33  ;;  %v165_v34 = vld [vmem:[%s164_s13] sm:$0x1]  ;;  %1109 = vmatpush3.bf16.msra.mxu0 %v1206_v21  ;;  %vm510_vm2 = vmand %vm462_vm0, %vm494_vm1  ;;  %vm558_vm3 = vcmp.lt.s32.totalorder %v461_v2, %v542_v4 }
  0x6c   :  { %v169_v35 = vld [vmem:[%s168_s14] sm:$0x1]  ;;  %166 = vst [vmem:[#allocation2 + $0x16] sm:$0x1] %v165_v34  ;;  %1110 = vmatprep.subr.bf16.mxu0 %v1207_v31  ;;  %vm574_vm4 = vmand %vm510_vm2, %vm558_vm3 }
  0x6d   :  { %1112 = vmatprep.mubr.bf16.mxu0 %v195_v27  ;;  %170 = vst [vmem:[#allocation2 + $0x17] sm:$0x1] %v169_v35  ;;  %v173_v36 = vld [vmem:[%s172_s15] sm:$0x1]  ;;  %1123 = vmatpush3.bf16.msra.mxu1 %v1211_v30  ;;  %v590_v5 = vsel %vm574_vm4, 0.25, %v1349_v0 }
  0x6e   :  { %v177_v37 = vld [vmem:[%s176_s16] sm:$0x1]  ;;  %174 = vst [vmem:[#allocation2 + $0x18] sm:$0x1] %v173_v36  ;;  %1124 = vmatprep.subr.bf16.mxu1 %v1212_v40 }
  0x6f   :  { %178 = vst [vmem:[#allocation2 + $0x19] sm:$0x1] %v177_v37  ;;  %v181_v38 = vld [vmem:[%s180_s17] sm:$0x1]  ;;  %1111 = vmatpush3.bf16.msra.mxu0 %v1207_v31 }
  0x70   :  { %v185_v39 = vld [vmem:[%s184_s18] sm:$0x1]  ;;  %182 = vst [vmem:[#allocation2 + $0x1a] sm:$0x1] %v181_v38 }
  0x71   :  { %186 = vst [vmem:[#allocation2 + $0x1b] sm:$0x1] %v185_v39  ;;  %v1213_v42 = vld [vmem:[#allocation11 + $0x28] sm:$0xff]   ;;  %1125 = vmatpush3.bf16.msra.mxu1 %v1212_v40 }
  0x72   :  { %1126 = vmatprep.subr.bf16.mxu1 %v1213_v42  ;;  %v1030_v47 = vld [vmem:[%s1576_s4] ss:$0 sm:$0xff] }
  0x73   :  { %v1039_v6 = vld [vmem:[%s1578_s6] ss:$0 sm:$0xff]  ;;  %s1351_s6 = smov [#allocation12]  }
  0x74   :  { %v193_v41 = vld [vmem:[#allocation2 + $0x10] sm:$0xff]  ;;  %s971_s23 = sshll.u32 %s1351_s6, 4  ;;  %s972_s23 = int_to_ptr.vmem [resolvable:$true] %s971_s23 }
  0x75   :  { %1127 = vmatpush3.bf16.msra.mxu1 %v1213_v42  ;;  %s1310_s24 = scalar_lea.vmem %s972_s23, 256  ;;  %p1315_p7 = scmp.lt.s32.totalorder %s972_s23, %s972_s23 }
  0x76   :  { %1128 = vmatprep.subr.bf16.mxu1 %v1214_v45  ;;  %p1311_p6 = scmp.ne.s32.totalorder %s972_s23, %s1310_s24  ;;  %p1316_p8 = scmp.lt.s32.totalorder %s1310_s24, %s1310_s24 }
  0x78   :  { %v194_v43 = vld [vmem:[#allocation2 + $0x18] sm:$0xff]  ;;  %p1317_p9 = por %p1316_p8, %p1315_p7 }
  0x79   :  { %v196_v44 = vpack.c.bf16 %v194_v43, %v193_v41  ;;  %1129 = vmatpush3.bf16.msra.mxu1 %v1214_v45 }
  0x7a   :  { %1130 = vmatprep.subr.bf16.mxu1 %v1215_v46  ;;  %p1318_p10 = pnand %p1317_p9, %p1311_p6 }
  0x7b   :  { %1113 = vmatmul.mubr.bf16.vlgmr.msra.gmra.mrb[0].mxu0 %v196_v44 }
  0x7c   :  { %1140 = vmatprep.mubr.msk.f32.mxu0 %vm606_vm5, %v590_v5 }
  0x7d   :  { %1131 = vmatpush3.bf16.msra.mxu1 %v1215_v46 }
  0x7e   :  { %1164 = vmatprep.subr.bf16.mxu1 %v1349_v0 }
 0x14e   :  { %v1114_v48 = vpop.f32.mrb[0].mxu0 }
 0x14f   :  { %v311_v49 = vadd.f32 %v1114_v48, %v1030_v47  ;;  %v302_v50 = vpop.f32.mrb[1].mxu0 }
 0x150   :  { %v303_v51 = vadd.f32 %v1030_v47, %v302_v50  ;;  %v1115_v52 = vpop.f32.mrb[2].mxu0 }
 0x151   :  { %v314_v53 = vadd.f32 %v1115_v52, %v1030_v47  ;;  %v305_v54 = vpop.f32.mrb[3].mxu0  ;;  %v319_v56 = vmax.f32 %v311_v49, 0.0 }
 0x152   :  { %v306_v55 = vadd.f32 %v1030_v47, %v305_v54  ;;  %v317_v58 = vmax.f32 %v303_v51, 0.0 }
 0x153   :  { %v320_v57 = vmax.f32 %v314_v53, 0.0 }
 0x154   :  { %v318_v59 = vmax.f32 %v306_v55, 0.0 }
 0x155   :  { %v322_v60 = vpack.c.bf16 %v320_v57, %v319_v56 }
 0x156   :  { %v321_v61 = vpack.c.bf16 %v318_v59, %v317_v58 }
 0x158   :  { %1132 = vmatprep.mubr.bf16.mxu1 %v321_v61 }
 0x159   :  { %1133 = vmatmul.mubr.bf16.vlgmr.msra.gmra.mrb[0].mxu1 %v322_v60 }
 0x15a   :  { %1180 = vmatprep.mubr.msk.bf16.mxu1 %vm1350_vm6, %v1349_v0 }
 0x22c   :  { %v1134_v7 = vpop.f32.mrb[0].mxu1 }
 0x22d   :  { %v1521_v8 = vadd.f32 %v1134_v7, %v1039_v6  ;;  %v428_v9 = vpop.f32.mrb[1].mxu1 }
 0x22e   :  { %v1135_v10 = vpop.f32.mrb[2].mxu1  ;;  %v429_v13 = vadd.f32 %v1039_v6, %v428_v9 }
 0x22f   :  { %v1523_v11 = vadd.f32 %v1135_v10, %v1039_v6  ;;  %v431_v12 = vpop.f32.mrb[3].mxu1  ;;  %v800_v55 = vmul.f32 %v1521_v8, %v1521_v8 }
 0x230   :  { %v432_v14 = vadd.f32 %v1039_v6, %v431_v12 }
 0x231   :  { %v854_v15 = vpack.c.bf16 %v1523_v11, %v1521_v8  ;;  %v801_v58 = vmul.f32 %v1523_v11, %v1523_v11 }
 0x232   :  { %v1184_v16 = vpack.c.bf16 %v432_v14, %v429_v13  ;;  %v938_v13 = vsub.s32 0, %v1512_v63 }
 0x234   :  { %1185 = vmatprep.subr.bf16.mxu0 %v1184_v16 }
 0x235   :  { %1187 = vmatpush3.bf16.msra.mxu0 %v1184_v16 }
 0x238   :  { %1141 = vmatmul.mubr.f32.vlgmr.msra.gmra.mrb[4].mxu0 %v1349_v0 }
 0x239   :  { %1143 = vmatprep.mubr.f32.mxu0 %v1349_v0 }
 0x23c   :  { %1144 = vmatmul.mubr.f32.gmra.mrb[6].mxu0 %v1349_v0 }
 0x23d   :  { %1146 = vmatprep.mubr.f32.mxu0 %v1349_v0 }
 0x240   :  { %1147 = vmatmul.mubr.f32.gmra.mrb[8].mxu0 %v1349_v0 }
 0x241   :  { %1149 = vmatprep.mubr.f32.mxu0 %v1349_v0 }
 0x244   :  { %1150 = vmatmul.mubr.f32.gmra.mrb[10].mxu0 %v1349_v0 }
 0x245   :  { %1152 = vmatprep.mubr.f32.mxu0 %v1349_v0 }
 0x248   :  { %1153 = vmatmul.mubr.f32.gmra.mrb[12].mxu0 %v1349_v0 }
 0x249   :  { %1155 = vmatprep.mubr.f32.mxu0 %v1349_v0 }
 0x24c   :  { %1156 = vmatmul.mubr.f32.gmra.mrb[14].mxu0 %v1349_v0 }
 0x24d   :  { %1158 = vmatprep.mubr.f32.mxu0 %v1349_v0 }
 0x250   :  { %1159 = vmatmul.mubr.f32.gmra.mrb[16].mxu0 %v1349_v0 }
 0x251   :  { %1161 = vmatprep.mubr.f32.mxu0 %v1349_v0 }
 0x254   :  { %1162 = vmatmul.mubr.f32.gmra.mrb[18].mxu0 %v1349_v0 }
 0x30b   :  { %v1142_v17 = vpop.f32.mrb[4].mxu0 }
 0x30c   :  { %v721_v18 = vpop.f32.mrb[5].mxu0  ;;  %v807_v19 = vmul.f32 %v1142_v17, %v1142_v17 }
 0x30d   :  { %v855_v20 = vpack.c.bf16 %v1142_v17, %v721_v18  ;;  %v806_v23 = vmul.f32 %v721_v18, %v721_v18 }
 0x30e   :  { %824 = vadd.xlane.f32.xlu0 %v807_v19 }
 0x30f   :  { %v1145_v21 = vpop.f32.mrb[6].mxu0  ;;  %1165 = vmatpush3.bf16.xpose.msra.mxu1 %v855_v20 }
 0x310   :  { %v731_v22 = vpop.f32.mrb[7].mxu0  ;;  %1166 = vmatprep.subr.bf16.mxu1 %v1349_v0  ;;  %v809_v27 = vmul.f32 %v1145_v21, %v1145_v21 }
 0x311   :  { %v856_v24 = vpack.c.bf16 %v1145_v21, %v731_v22  ;;  %v808_v25 = vmul.f32 %v731_v22, %v731_v22 }
 0x312   :  { %822 = vadd.xlane.f32.xlu0 %v806_v23 }
 0x313   :  { %826 = vadd.xlane.f32.xlu1 %v808_v25  ;;  %v1148_v26 = vpop.f32.mrb[8].mxu0 }
 0x314   :  { %v741_v28 = vpop.f32.mrb[9].mxu0  ;;  %v811_v32 = vmul.f32 %v1148_v26, %v1148_v26 }
 0x315   :  { %v857_v29 = vpack.c.bf16 %v1148_v26, %v741_v28  ;;  %v810_v30 = vmul.f32 %v741_v28, %v741_v28 }
 0x317   :  { %1167 = vmatpush3.bf16.xpose.msra.mxu1 %v856_v24  ;;  %828 = vadd.xlane.f32.xlu1 %v809_v27  ;;  %v1151_v31 = vpop.f32.mrb[10].mxu0 }
 0x318   :  { %830 = vadd.xlane.f32.xlu0 %v810_v30  ;;  %v751_v33 = vpop.f32.mrb[11].mxu0  ;;  %1168 = vmatprep.subr.bf16.mxu1 %v1349_v0  ;;  %v813_v37 = vmul.f32 %v1151_v31, %v1151_v31 }
 0x319   :  { %v858_v34 = vpack.c.bf16 %v1151_v31, %v751_v33  ;;  %v812_v35 = vmul.f32 %v751_v33, %v751_v33 }
 0x31b   :  { %832 = vadd.xlane.f32.xlu1 %v811_v32  ;;  %v1154_v36 = vpop.f32.mrb[12].mxu0 }
 0x31c   :  { %834 = vadd.xlane.f32.xlu0 %v812_v35  ;;  %v761_v38 = vpop.f32.mrb[13].mxu0  ;;  %v815_v42 = vmul.f32 %v1154_v36, %v1154_v36 }
 0x31d   :  { %v859_v39 = vpack.c.bf16 %v1154_v36, %v761_v38  ;;  %v814_v40 = vmul.f32 %v761_v38, %v761_v38 }
 0x31f   :  { %1169 = vmatpush3.bf16.xpose.msra.mxu1 %v857_v29  ;;  %836 = vadd.xlane.f32.xlu1 %v813_v37  ;;  %v1157_v41 = vpop.f32.mrb[14].mxu0 }
 0x320   :  { %838 = vadd.xlane.f32.xlu0 %v814_v40  ;;  %v771_v43 = vpop.f32.mrb[15].mxu0  ;;  %1170 = vmatprep.subr.bf16.mxu1 %v1349_v0  ;;  %v817_v47 = vmul.f32 %v1157_v41, %v1157_v41 }
 0x321   :  { %v860_v44 = vpack.c.bf16 %v1157_v41, %v771_v43  ;;  %v816_v45 = vmul.f32 %v771_v43, %v771_v43 }
 0x323   :  { %840 = vadd.xlane.f32.xlu1 %v815_v42  ;;  %v1160_v46 = vpop.f32.mrb[16].mxu0 }
 0x324   :  { %842 = vadd.xlane.f32.xlu0 %v816_v45  ;;  %v781_v48 = vpop.f32.mrb[17].mxu0  ;;  %v819_v51 = vmul.f32 %v1160_v46, %v1160_v46 }
 0x325   :  { %v861_v49 = vpack.c.bf16 %v1160_v46, %v781_v48  ;;  %v818_v50 = vmul.f32 %v781_v48, %v781_v48 }
 0x327   :  { %1171 = vmatpush3.bf16.xpose.msra.mxu1 %v858_v34  ;;  %844 = vadd.xlane.f32.xlu1 %v817_v47  ;;  %v1163_v52 = vpop.f32.mrb[18].mxu0 }
 0x328   :  { %846 = vadd.xlane.f32.xlu0 %v818_v50  ;;  %1172 = vmatprep.subr.bf16.mxu1 %v1349_v0  ;;  %v791_v53 = vpop.f32.mrb[19].mxu0  ;;  %v821_v56 = vmul.f32 %v1163_v52, %v1163_v52 }
 0x329   :  { %v862_v54 = vpack.c.bf16 %v1163_v52, %v791_v53  ;;  %v820_v57 = vmul.f32 %v791_v53, %v791_v53 }
 0x32b   :  { %848 = vadd.xlane.f32.xlu1 %v819_v51 }
 0x32c   :  { %802 = vadd.xlane.f32.xlu0 %v800_v55 }
 0x32f   :  { %1173 = vmatpush3.bf16.xpose.msra.mxu1 %v859_v39  ;;  %852 = vadd.xlane.f32.xlu1 %v821_v56 }
 0x330   :  { %1174 = vmatprep.subr.bf16.mxu1 %v1349_v0  ;;  %850 = vadd.xlane.f32.xlu0 %v820_v57 }
 0x333   :  { %804 = vadd.xlane.f32.xlu1 %v801_v58 }
 0x337   :  { %1175 = vmatpush3.bf16.xpose.msra.mxu1 %v860_v44 }
 0x338   :  { %1176 = vmatprep.subr.bf16.mxu1 %v1349_v0 }
 0x33f   :  { %1177 = vmatpush3.bf16.xpose.msra.mxu1 %v861_v49 }
 0x340   :  { %1178 = vmatprep.subr.bf16.mxu1 %v1349_v0 }
 0x347   :  { %1179 = vmatpush3.bf16.xpose.msra.mxu1 %v862_v54 }
 0x34e   :  { %1181 = vmatmul.mubr.bf16.vlgmr.msra.gmra.mrb[4].mxu1 %v854_v15 }
 0x39b   :  { %v825_v59 = vpop.xlane.xlu0 %824 }
 0x39f   :  { %v823_v60 = vpop.xlane.xlu0 %822 }
 0x3a0   :  { %904 = vxpose.xlu0.b32.start [1/16] (narrow) %v823_v60, 8  ;;  %v827_v61 = vpop.xlane.xlu1 %826 }
 0x3a4   :  { %905 = vxpose.xlu0.b32.cont [2/16] (narrow) %v825_v59, 8  ;;  %v829_v62 = vpop.xlane.xlu1 %828 }
 0x3a5   :  { %v831_v1 = vpop.xlane.xlu0 %830 }
 0x3a8   :  { %906 = vxpose.xlu0.b32.cont [3/16] (narrow) %v827_v61, 8  ;;  %v833_v2 = vpop.xlane.xlu1 %832 }
 0x3a9   :  { %v835_v3 = vpop.xlane.xlu0 %834 }
 0x3ac   :  { %907 = vxpose.xlu0.b32.cont [4/16] (narrow) %v829_v62, 8  ;;  %v837_v0 = vpop.xlane.xlu1 %836 }
 0x3ad   :  { %v839_v4 = vpop.xlane.xlu0 %838 }
 0x3b0   :  { %908 = vxpose.xlu0.b32.cont [5/16] (narrow) %v831_v1, 8  ;;  %v841_v5 = vpop.xlane.xlu1 %840 }
 0x3b1   :  { %v843_v6 = vpop.xlane.xlu0 %842 }
 0x3b4   :  { %909 = vxpose.xlu0.b32.cont [6/16] (narrow) %v833_v2, 8  ;;  %v845_v7 = vpop.xlane.xlu1 %844 }
 0x3b5   :  { %v847_v8 = vpop.xlane.xlu0 %846 }
 0x3b8   :  { %910 = vxpose.xlu0.b32.cont [7/16] (narrow) %v835_v3, 8  ;;  %v849_v9 = vpop.xlane.xlu1 %848 }
 0x3b9   :  { %v803_v10 = vpop.xlane.xlu0 %802 }
 0x3bc   :  { %911 = vxpose.xlu0.b32.cont [8/16] (narrow) %v837_v0, 8  ;;  %v853_v12 = vpop.xlane.xlu1 %852 }
 0x3bd   :  { %v851_v11 = vpop.xlane.xlu0 %850 }
 0x3c0   :  { %912 = vxpose.xlu0.b32.cont [9/16] (narrow) %v839_v4, 8  ;;  %v805_v17 = vpop.xlane.xlu1 %804 }
 0x3c4   :  { %913 = vxpose.xlu0.b32.cont [10/16] (narrow) %v841_v5, 8 }
 0x3c8   :  { %914 = vxpose.xlu0.b32.cont [11/16] (narrow) %v843_v6, 8 }
 0x3cc   :  { %915 = vxpose.xlu0.b32.cont [12/16] (narrow) %v845_v7, 8 }
 0x3d0   :  { %916 = vxpose.xlu0.b32.cont [13/16] (narrow) %v847_v8, 8 }
 0x3d4   :  { %917 = vxpose.xlu0.b32.cont [14/16] (narrow) %v849_v9, 8 }
 0x3d8   :  { %918 = vxpose.xlu0.b32.cont [15/16] (narrow) %v851_v11, 8 }
 0x3dc   :  { %919 = vxpose.xlu0.b32.end [16/16] (narrow) %v853_v12, 8 }
 0x420   :  { %v920_v14 = vpop.trf.xlu0 }
 0x421   :  { %v939_v15 = vrot.slane %v920_v14, %v938_v13  ;;  %v897_v16 = vpop.f32.mrb[4].mxu1 }
 0x422   :  { %v942_v18 = vmul.f32 2.0, %v897_v16  ;;  %v1182_v19 = vpop.f32.mrb[5].mxu1 }
 0x423   :  { %v940_v20 = vadd.f32 %v939_v15, %v803_v10  ;;  %v941_v21 = vadd.f32 %v939_v15, %v805_v17  ;;  %v900_v22 = vpop.f32.mrb[6].mxu1 }
 0x424   :  { %v943_v23 = vmul.f32 2.0, %v900_v22  ;;  %v1183_v24 = vpop.f32.mrb[7].mxu1 }
 0x425   :  { %v944_v25 = vsub.f32 %v940_v20, %v942_v18 }
 0x426   :  { %v945_v26 = vsub.f32 %v941_v21, %v943_v23 }
 0x427   :  { %v946_v27 = vmax.f32 %v944_v25, 1e-08 }
 0x428   :  { %v947_v28 = vmax.f32 %v945_v26, 1e-08 }
 0x429   :  { %1216 = vrsqrt.f32 %v946_v27  ;;  %vm950_vm7 = vcmp.eq.f32.partialorder %v946_v27, inf  ;;  %v953_v31 = vand.u32 2147483648, %v946_v27  ;;  %vm952_vm8 = vcmp.eq.f32.partialorder %v946_v27, 0.0 }
 0x42a   :  { %1218 = vrsqrt.f32 %v947_v28  ;;  %vm957_vm9 = vcmp.eq.f32.partialorder %v947_v28, inf  ;;  %v960_v34 = vand.u32 2147483648, %v947_v28  ;;  %vm959_vm10 = vcmp.eq.f32.partialorder %v947_v28, 0.0 }
 0x433   :  { %v1217_v29 = vpop.eup %1216 }
 0x434   :  { %v1219_v30 = vpop.eup %1218  ;;  %v949_v63 = vmul.f32 %v1217_v29, %v946_v27 }
 0x435   :  { %v956_v32 = vmul.f32 %v1219_v30, %v947_v28 }
 0x436   :  { %v951_v33 = vsel %vm950_vm7, %v946_v27, %v949_v63 }
 0x437   :  { %v954_v35 = vsel %vm952_vm8, %v953_v31, %v951_v33  ;;  %v958_v36 = vsel %vm957_vm9, %v947_v28, %v956_v32 }
 0x438   :  { %v961_v37 = vsel %vm959_vm10, %v960_v34, %v958_v36  ;;  %v962_v38 = vsub.f32 0.0, %v954_v35 }
 0x439   :  { %v963_v39 = vsub.f32 0.0, %v961_v37 }
 0x43a   :  { %964 = vst [vmem:[#allocation12] sm:$0xff] %v962_v38 }
 0x43b   :  { %965 = vst [vmem:[#allocation12 + $0x8] sm:$0xff] %v963_v39 }
 0x43c   :  { %1321 = shalt.err (!%p1318_p10)
}
 0x43d   :  { %s1322_s20 = scalar_lea.hbm %s1579_s7, 256 }
 0x43e   :  { %p1323_p11 = scmp.ne.s32.totalorder %s1579_s7, %s1322_s20  ;;  %p1326_p12 = scmp.lt.u32.totalorder %s1322_s20, %s1579_s7 }
 0x440   :  { %p1328_p13 = pnand %p1326_p12, %p1323_p11 }
 0x442   :  { %1331 = shalt.err (!%p1328_p13)
}
 0x443   :  { %977 = dma.vmem_to_hbm [thread:$0]  %s972_s23, 256, %s1579_s7, [#allocation8], %s1346_s3, %s1346_s3, %s1347_s0  }
 0x444   :  { %1338 = dma.done.wait [#allocation8], 256  }
 0x445   :  { %1339 = vsyncadd [#allocation8], 4294967040 }
 0x446   :  { %981 = vsyncpa [#allocation7], 1 }
 0x447   :  { %982 = vsyncpa [#allocation10], 1 }
 0x448   :  { %983 = vsyncpa [#allocation8], 1 }

</bundles_post_ra>
